<compile_context>
chip_gen: v7x
topology: tpu7x:2x2x1
jax: 0.10.0
libtpu: 0.0.40
codegen_flags: <defaults>
</compile_context>

<pallas_src>
import math

import jax
import jax.numpy as jnp
from jax.experimental import pallas as pl
from jax.experimental.pallas import tpu as pltpu


def _round_up(x, m):
    return (x + m - 1) // m * m


def _topicnet2_kernel(x_ref, w_ref, o_ref):
    # x_ref: (tm, D_in), w_ref: (D_in, D_out_p), o_ref: (tm, D_out_p)
    # MXU matmul with f32 accumulation; ReLU (clamp(min=0)) on the VPU in f32,
    # then cast to the output dtype for the (lane-dense) store.
    y = jnp.dot(x_ref[...], w_ref[...], preferred_element_type=jnp.float32)
    o_ref[...] = jnp.maximum(y, 0.0).astype(o_ref.dtype)


def prepare_topicnet2_weight(weight, compute_dtype=None):
    """One-time weight prep (call at init, NOT per forward).

    weight: PyTorch-layout (D_out, D_in) Linear weight.
    Returns (w_pad, D_out) where w_pad is (D_in, D_out_p) with D_out_p a multiple
    of 128 (lane-dense stores) and zero-padded columns (relu(x @ 0) == 0).
    compute_dtype: optional narrow MXU input dtype (e.g. jnp.bfloat16) -- valid on
    all TPU generations since accumulation stays f32 in the kernel.
    """
    D_out, D_in = weight.shape
    w_t = weight.T  # (D_in, D_out): K-major for the MXU, transpose done once here.
    D_out_p = _round_up(D_out, 128)
    if D_out_p != D_out:
        w_t = jnp.pad(w_t, ((0, 0), (0, D_out_p - D_out)))
    if compute_dtype is not None:
        w_t = w_t.astype(compute_dtype)
    return w_t, D_out


def _pick_batch_tile(B, block_b):
    """Batch tile: multiple of 8, as large as block_b, >=2 tiles for big batches."""
    tm = min(_round_up(block_b, 8), _round_up(B, 8))
    # v7x megacore: if the whole batch fits one tile but is big enough to split,
    # use two 'parallel' grid steps so both TensorCores get work.
    if pl.cdiv(B, tm) < 2 and B >= 1024:
        tm = _round_up(pl.cdiv(B, 2), 8)
    return tm


def topicnet2_forward(x, w_pad, d_out, *, block_b=2048,
                      out_dtype=jnp.float32, slice_output=True):
    """relu(x @ W^T) for TopicNet2.

    x:      (..., D_in) activations.
    w_pad:  (D_in, D_out_p) weight from prepare_topicnet2_weight (already padded,
            optionally already narrow-dtype).
    d_out:  logical output width (<= D_out_p).
    Returns (..., d_out) in out_dtype (or (..., D_out_p) if slice_output=False).
    """
    orig_shape = x.shape
    D_in = orig_shape[-1]
    if x.ndim != 2:
        x = x.reshape(-1, D_in)
    B = x.shape[0]

    D_in_w, D_out_p = w_pad.shape
    assert D_in == D_in_w, (D_in, D_in_w)

    # MXU input dtype follows the (pre-cast) weight dtype.
    if x.dtype != w_pad.dtype:
        x = x.astype(w_pad.dtype)

    tm = _pick_batch_tile(B, block_b)
    num_tiles = pl.cdiv(B, tm)

    x_itemsize = jnp.dtype(x.dtype).itemsize
    o_itemsize = jnp.dtype(out_dtype).itemsize
    w_bytes = w_pad.size * jnp.dtype(w_pad.dtype).itemsize

    # Resident-W VMEM budget (conservative: assume W is double-buffered too).
    vmem_needed = (2 * w_bytes
                   + 2 * tm * D_in * x_itemsize
                   + 2 * tm * D_out_p * o_itemsize)
    if vmem_needed > (48 << 20):
        # TODO(synk): add a D_out (N) grid axis or a K reduction axis with an f32
        # VMEM accumulator when W no longer fits resident in VMEM (v7x: 64 MiB).
        raise ValueError(
            f"TopicNet2 resident-W tiling needs ~{vmem_needed >> 20} MiB VMEM; "
            "tile N or K for these dimensions.")

    cp_kwargs = dict(dimension_semantics=("parallel",))
    if vmem_needed > (16 << 20):  # exceeds v5e's default scoped VMEM
        cp_kwargs["vmem_limit_bytes"] = int(min(vmem_needed + (8 << 20), 48 << 20))

    # Cost built from final shapes; W counted once (revisited, not re-fetched).
    cost = pl.CostEstimate(
        flops=2 * num_tiles * tm * D_in * D_out_p,
        transcendentals=0,
        bytes_accessed=(num_tiles * tm * D_in * x_itemsize
                        + w_bytes
                        + num_tiles * tm * D_out_p * o_itemsize),
    )

    y_p = pl.pallas_call(
        _topicnet2_kernel,
        out_shape=jax.ShapeDtypeStruct((B, D_out_p), out_dtype),
        grid=(num_tiles,),
        in_specs=[
            pl.BlockSpec((tm, D_in), lambda i: (i, 0)),
            pl.BlockSpec((D_in, D_out_p), lambda i: (0, 0)),  # W resident in VMEM
        ],
        out_specs=pl.BlockSpec((tm, D_out_p), lambda i: (i, 0)),
        compiler_params=pltpu.CompilerParams(**cp_kwargs),
        cost_estimate=cost,
    )(x, w_pad)

    if slice_output and D_out_p != d_out:
        y_p = y_p[:, :d_out]
    out_width = y_p.shape[-1]
    if len(orig_shape) != 2:
        y_p = y_p.reshape(orig_shape[:-1] + (out_width,))
    return y_p


if __name__ == "__main__":
    # Small shapes consistent with the module: x is (batch, D_in).
    B, D_in, D_out = 8, 32, 64

    key = jax.random.PRNGKey(0)
    k_x, k_w = jax.random.split(key)

    # torch.nn.Linear default init: U(-1/sqrt(D_in), 1/sqrt(D_in)), weight (D_out, D_in).
    bound = 1.0 / math.sqrt(D_in)
    weight = jax.random.uniform(
        k_w, (D_out, D_in), dtype=jnp.float32, minval=-bound, maxval=bound
    )
    x = jax.random.normal(k_x, (B, D_in), dtype=jnp.float32)

    # Weight is prepared (transpose + lane-dense pad) exactly once.
    w_pad, d_out = prepare_topicnet2_weight(weight)

    # --- f32 path (single-tile grid, lane-dense output), strict check ------------
    y = jax.block_until_ready(topicnet2_forward(x, w_pad, d_out))
    y_ref = jnp.maximum(x @ weight.T, 0.0)
    assert y.shape == (B, D_out)
    assert jnp.allclose(y, y_ref, atol=1e-5, rtol=1e-5)

    # --- bf16 MXU-input path (valid on v5e/v6e/v7x), f32 accumulation ------------
    w_pad_bf16, _ = prepare_topicnet2_weight(weight, compute_dtype=jnp.bfloat16)
    y_bf16 = jax.block_until_ready(topicnet2_forward(x, w_pad_bf16, d_out))
    y_bf16_ref = jnp.maximum(
        jnp.dot(x.astype(jnp.bfloat16), weight.T.astype(jnp.bfloat16),
                preferred_element_type=jnp.float32),
        0.0,
    )
    assert jnp.allclose(y_bf16, y_bf16_ref, atol=1e-3, rtol=1e-2)

    # --- multi-step gridded path with a ragged last block (no x re-pad in HBM) ---
    B_big = 272  # not a tile multiple on purpose: 3 grid steps, last one masked
    x_big = jax.random.normal(jax.random.PRNGKey(1), (B_big, D_in), dtype=jnp.float32)
    y_big = jax.block_until_ready(topicnet2_forward(x_big, w_pad, d_out, block_b=128))
    y_big_ref = jnp.maximum(x_big @ weight.T, 0.0)
    assert y_big.shape == (B_big, D_out)
    assert jnp.allclose(y_big, y_big_ref, atol=1e-5, rtol=1e-5)

    # --- bf16 outputs + padded (lane-dense) output kept for a fused consumer -----
    y_pad = jax.block_until_ready(
        topicnet2_forward(x_big, w_pad, d_out, block_b=128,
                          out_dtype=jnp.bfloat16, slice_output=False)
    )
    assert y_pad.shape == (B_big, w_pad.shape[1])
    assert jnp.allclose(y_pad[:, :D_out].astype(jnp.float32), y_big_ref,
                        atol=2e-2, rtol=2e-2)
    assert jnp.all(y_pad[:, D_out:] == 0)

    print("KERNEL_OK")
</pallas_src>

<mosaic_0001>
module attributes {stable_mosaic.version = 11 : i64} {
  func.func @_topicnet2_kernel(%arg0: i32, %arg1: memref<8x32xf32, #tpu.memory_space<vmem>>, %arg2: memref<32x128xf32, #tpu.memory_space<vmem>>, %arg3: memref<8x128xf32, #tpu.memory_space<vmem>>) attributes {dimension_semantics = [#tpu.dimension_semantics<parallel>], iteration_bounds = array<i64: 1>, scalar_prefetch = 0 : i64, scratch_operands = 0 : i64, tpu.core_type = #tpu.core_type<tc>, window_params = [{transform_indices = @transform_0, window_bounds = array<i64: 8, 32>}, {pipeline_mode = #tpu.pipeline_mode<synchronous>, transform_indices = @transform_1, window_bounds = array<i64: 32, 128>}, {transform_indices = @transform_2, window_bounds = array<i64: 8, 128>}]} {
    %c0 = arith.constant 0 : index
    %c0_0 = arith.constant 0 : index
    %0 = vector.load %arg1[%c0, %c0_0] : memref<8x32xf32, #tpu.memory_space<vmem>>, vector<8x32xf32>
    %c0_1 = arith.constant 0 : index
    %c0_2 = arith.constant 0 : index
    %1 = vector.load %arg2[%c0_1, %c0_2] : memref<32x128xf32, #tpu.memory_space<vmem>>, vector<32x128xf32>
    %cst = arith.constant dense<0.000000e+00> : vector<8x128xf32>
    %2 = tpu.matmul %0, %1, %cst {dimension_numbers = #tpu.dot_dimension_numbers<[1], [0], [0], [1], [0, 0, 1, 1], [], []>} : vector<8x32xf32>, vector<32x128xf32>, vector<8x128xf32> -> vector<8x128xf32>
    %cst_3 = arith.constant 0.000000e+00 : f32
    %3 = vector.broadcast %cst_3 : f32 to vector<8x128xf32>
    %4 = arith.maximumf %2, %3 : vector<8x128xf32>
    %c0_4 = arith.constant 0 : index
    %c0_5 = arith.constant 0 : index
    %5 = vector.load %arg3[%c0_4, %c0_5] : memref<8x128xf32, #tpu.memory_space<vmem>>, vector<8x128xf32>
    tpu.vector_store %arg3[%c0_4, %c0_5], %4 {strides = array<i32>} : memref<8x128xf32, #tpu.memory_space<vmem>>, vector<8x128xf32>,
    return
  }
  func.func @transform_0(%arg0: i32) -> (i32, i32) {
    %c0_i32 = arith.constant 0 : i32
    %c0_i32_0 = arith.constant 0 : i32
    return %arg0, %c0_i32 : i32, i32
  }
  func.func @transform_1(%arg0: i32) -> (i32, i32) {
    %c0_i32 = arith.constant 0 : i32
    %c0_i32_0 = arith.constant 0 : i32
    %c0_i32_1 = arith.constant 0 : i32
    return %c0_i32, %c0_i32_0 : i32, i32
  }
  func.func @transform_2(%arg0: i32) -> (i32, i32) {
    %c0_i32 = arith.constant 0 : i32
    %c0_i32_0 = arith.constant 0 : i32
    return %arg0, %c0_i32 : i32, i32
  }
}

</mosaic_0001>

<bundles_post_ra>
// kernel: tpu_custom_call.1
= control target key start
LH: loop header
LB: loop body
LE: loop exit
PB: predicated region body
PF: predicated region fallthrough
CT: control target
= control target key end

     0   :  { %7 = vsyncpa [#allocation3], 0  ;;  %s304_s0 = inlined_call_operand.hbm [shape: f32[8,32], index: 0, kind: input, shape index: {}]   ;;  %s305_s1 = inlined_call_operand.hbm [shape: f32[32,128], index: 1, kind: input, shape index: {}]   ;;  %s306_s2 = inlined_call_operand.hbm [shape: f32[8,128], index: 2, kind: output, shape index: {}]  }
   0x1   :  { %8 = vsyncpa [#allocation6], 0 }
   0x2   :  { %9 = vsyncpa [#allocation4], 0  ;;  %s238_s9 = smov [#allocation2]   ;;  %s239_s11 = smov [#allocation5]  }
   0x3   :  { %s16_s10 = sshll.u32 %s238_s9, 4  ;;  %s25_s12 = sshll.u32 %s239_s11, 4  ;;  %s17_s10 = int_to_ptr.vmem [resolvable:$true] %s16_s10  ;;  %s261_s12 = int_to_ptr.vmem [resolvable:$true] %s25_s12 }
   0x4   :  { %s166_s15 = scalar_lea.hbm %s304_s0, 128 }
   0x5   :  { %p167_p0 = scmp.ne.s32.totalorder %s304_s0, %s166_s15  ;;  %p170_p1 = scmp.lt.u32.totalorder %s166_s15, %s304_s0 }
   0x7   :  { %p172_p2 = pnand %p170_p1, %p167_p0 }
   0x9   :  { %175 = shalt.err (!%p172_p2)
}
   0xa   :  { %s176_s20 = scalar_lea.vmem %s17_s10, 128  ;;  %p181_p4 = scmp.lt.s32.totalorder %s17_s10, %s17_s10 }
   0xb   :  { %p177_p3 = scmp.ne.s32.totalorder %s17_s10, %s176_s20  ;;  %p182_p5 = scmp.lt.s32.totalorder %s176_s20, %s176_s20 }
   0xd   :  { %p183_p6 = por %p182_p5, %p181_p4 }
   0xf   :  { %p184_p7 = pnand %p183_p6, %p177_p3 }
  0x11   :  { %187 = shalt.err (!%p184_p7)
}
  0x12   :  { %19 = dma.hbm_to_vmem [thread:$0]  %s304_s0, 128, %s17_s10, [#allocation3]  }
  0x13   :  { %s188_s25 = scalar_lea.hbm %s305_s1, 512 }
  0x14   :  { %p189_p8 = scmp.ne.s32.totalorder %s305_s1, %s188_s25  ;;  %p192_p9 = scmp.lt.u32.totalorder %s188_s25, %s305_s1 }
  0x16   :  { %p194_p10 = pnand %p192_p9, %p189_p8 }
  0x18   :  { %197 = shalt.err (!%p194_p10)
}
  0x19   :  { %s198_s30 = scalar_lea.vmem %s261_s12, 512  ;;  %p203_p12 = scmp.lt.s32.totalorder %s261_s12, %s261_s12 }
  0x1a   :  { %p199_p11 = scmp.ne.s32.totalorder %s261_s12, %s198_s30  ;;  %p204_p13 = scmp.lt.s32.totalorder %s198_s30, %s198_s30 }
  0x1c   :  { %p205_p0 = por %p204_p13, %p203_p12 }
  0x1e   :  { %p206_p1 = pnand %p205_p0, %p199_p11 }
  0x20   :  { %209 = shalt.err (!%p206_p1)
}
  0x21   :  { %s240_s0 = smov 128   ;;  %s241_s3 = smov 8  }
  0x22   :  { %31 = dma.hbm_to_vmem [thread:$0]  %s305_s1, 512, %s261_s12, [#allocation6], %s240_s0, %s240_s0, %s241_s3  }
  0x23   :  { %232 = dma.done.wait [#allocation3], 128  }
  0x24   :  { %233 = vsyncadd [#allocation3], 4294967168 }
  0x25   :  { %234 = dma.done.wait [#allocation6], 512  }
  0x26   :  { %235 = vsyncadd [#allocation6], 4294966784  ;;  %v242_v0 = vmov 0.0|0.0   ;;  %vm243_vm0 = vmmov 0   ;;  %v244_v1 = vmov 0.0   ;;  %v39_v2 = vld [vmem:[#allocation5] sm:$0xff] }
  0x27   :  { %152 = vmatprep.subr.bf16.mxu0 %v242_v0  ;;  %149 = vmatprep.mubr.msk.f32.mxu0 %vm243_vm0, %v244_v1  ;;  %v40_v3 = vld [vmem:[#allocation5 + $0x8] sm:$0xff]  ;;  %v41_v4 = vld [vmem:[#allocation5 + $0x10] sm:$0xff]  ;;  %v42_v6 = vld [vmem:[#allocation5 + $0x18] sm:$0xff]  ;;  %vm43_vm1 = vcmask 261120   ;;  %s245_s1 = smov [#allocation7]  }
  0x28   :  { %v153_v5 = vpack.c.bf16 %v40_v3, %v39_v2  ;;  %v156_v7 = vpack.c.bf16 %v42_v6, %v41_v4  ;;  %v38_v8 = vld [vmem:[#allocation2] sm:$0xff]  ;;  %s125_s6 = sshll.u32 %s245_s1, 4  ;;  %s126_s6 = int_to_ptr.vmem [resolvable:$true] %s125_s6 }
  0x29   :  { %s210_s7 = scalar_lea.vmem %s126_s6, 128  ;;  %p215_p3 = scmp.lt.s32.totalorder %s126_s6, %s126_s6 }
  0x2a   :  { %154 = vmatpush3.bf16.msra.mxu0 %v153_v5  ;;  %p211_p2 = scmp.ne.s32.totalorder %s126_s6, %s210_s7  ;;  %p216_p4 = scmp.lt.s32.totalorder %s210_s7, %s210_s7 }
  0x2b   :  { %155 = vmatprep.subr.bf16.mxu0 %v242_v0 }
  0x2c   :  { %p217_p5 = por %p216_p4, %p215_p3 }
  0x2e   :  { %157 = vmatpush3.bf16.msra.mxu0 %v156_v7  ;;  %p218_p6 = pnand %p217_p5, %p211_p2 }
  0x31   :  { %150 = vmatmul.mubr.msk.f32.vlgmr.msra.gmra.mrb[0].mxu0 %vm43_vm1, %v38_v8 }
 0x104   :  { %v113_v9 = vpop.f32.mrb[0].mxu0 }
 0x105   :  { %v117_v10 = vmax.f32 %v113_v9, 0.0  ;;  %v151_v11 = vpop.f32.mrb[1].mxu0 }
 0x107   :  { %118 = vst [vmem:[#allocation7] sm:$0xff] %v117_v10 }
 0x108   :  { %221 = shalt.err (!%p218_p6)
}
 0x109   :  { %s222_s10 = scalar_lea.hbm %s306_s2, 128 }
 0x10a   :  { %p223_p7 = scmp.ne.s32.totalorder %s306_s2, %s222_s10  ;;  %p226_p8 = scmp.lt.u32.totalorder %s222_s10, %s306_s2 }
 0x10c   :  { %p228_p9 = pnand %p226_p8, %p223_p7 }
 0x10e   :  { %231 = shalt.err (!%p228_p9)
}
 0x10f   :  { %128 = dma.vmem_to_hbm [thread:$0]  %s126_s6, 128, %s306_s2, [#allocation4]  }
 0x110   :  { %236 = dma.done.wait [#allocation4], 128  }
 0x111   :  { %237 = vsyncadd [#allocation4], 4294967168 }
 0x112   :  { %132 = vsyncpa [#allocation3], 1 }
 0x113   :  { %133 = vsyncpa [#allocation6], 1 }
 0x114   :  { %134 = vsyncpa [#allocation4], 1 }

</bundles_post_ra>
